<compile_context>
chip_gen: v7x
topology: tpu7x:2x2x1
jax: 0.10.0
libtpu: 0.0.40
codegen_flags: <defaults>
</compile_context>

<pallas_src>
import jax
import jax.numpy as jnp
from jax.experimental import pallas as pl
from jax.experimental.pallas import tpu as pltpu


def _round_up(a, m):
    return ((a + m - 1) // m) * m


def _classifier_kernel(x_ref, w1_ref, b1_ref, w2_ref, b2_ref, out_ref, acc_ref):
    # x_ref:  [tm, tk]  bf16   flattened-screenshot tile
    # w1_ref: [tk, 256] bf16   base-model projection tile (pre-transposed vs PyTorch)
    # b1_ref: [1, 256]  f32
    # w2_ref: [1, 256]  f32    classifier weight as a row
    # b2_ref: [1, 1]    f32
    # out_ref:[tm, 128] f32    lane-dense logits slab (column 0 is the answer)
    # acc_ref:[tm, 256] f32    VMEM accumulator, resident across the K axis
    k = pl.program_id(1)

    @pl.when(k == 0)
    def _():
        acc_ref[...] = jnp.zeros_like(acc_ref)

    # MXU partial product in bf16, accumulated in f32.
    acc_ref[...] += jnp.dot(
        x_ref[...], w1_ref[...], preferred_element_type=jnp.float32
    )

    @pl.when(k == pl.num_programs(1) - 1)
    def _():
        # f32 epilogue on the accumulator: bias + relu (base_model nonlinearity).
        emb = jnp.maximum(acc_ref[...] + b1_ref[...], 0.0)            # [tm, 256]
        # Head Linear(256, 1): VPU multiply + lane reduce (XLU) instead of an
        # N=1 MXU matmul that would use <1% of the MXU columns.
        logits = jnp.sum(emb * w2_ref[...], axis=-1, keepdims=True)   # [tm, 1]
        logits = logits + b2_ref[...]
        # Lane-dense store: broadcast across the 128 lanes -> unmasked full vst.
        out_ref[...] = jnp.broadcast_to(logits, out_ref.shape).astype(out_ref.dtype)


def screenshot_classifier_forward(x, w1, b1, w2, b2, *, tk=512):
    """x: [B, C, H, W] float32. Returns logits of shape [B] (float32)."""
    B = x.shape[0]
    F = x.shape[1] * x.shape[2] * x.shape[3]
    E = w1.shape[1]  # embedding dim (256 per the module spec)

    # Batch tile: multiple of 8 sublanes, capped at 128 rows per MXU call.
    tm = min(128, _round_up(B, 8))
    B_pad = _round_up(B, tm)
    # K tile: multiple of 128 lanes; pad F up to a tile multiple.
    tk = min(tk, _round_up(F, 128))
    F_pad = _round_up(F, tk)

    x_flat = x.reshape(B, F)

    # Pad and cast matmul operands to bf16 (zero padding contributes nothing to
    # the K reduction; padded batch rows are sliced off at the end).
    x_p = (
        jnp.zeros((B_pad, F_pad), jnp.bfloat16)
        .at[:B, :F]
        .set(x_flat.astype(jnp.bfloat16))
    )
    w1_p = jnp.zeros((F_pad, E), jnp.bfloat16).at[:F, :].set(w1.astype(jnp.bfloat16))
    b1_row = b1.reshape(1, E).astype(jnp.float32)
    w2_row = w2.reshape(1, E).astype(jnp.float32)
    b2_s = b2.reshape(1, 1).astype(jnp.float32)

    grid = (B_pad // tm, F_pad // tk)

    out = pl.pallas_call(
        _classifier_kernel,
        out_shape=jax.ShapeDtypeStruct((B_pad, 128), jnp.float32),
        grid_spec=pltpu.PrefetchScalarGridSpec(
            num_scalar_prefetch=0,
            grid=grid,
            in_specs=[
                pl.BlockSpec((tm, tk), lambda i, k: (i, k)),   # x tile
                pl.BlockSpec((tk, E), lambda i, k: (k, 0)),    # w1 tile
                pl.BlockSpec((1, E), lambda i, k: (0, 0)),     # b1 (resident)
                pl.BlockSpec((1, E), lambda i, k: (0, 0)),     # w2 row (resident)
                pl.BlockSpec((1, 1), lambda i, k: (0, 0)),     # b2 (resident)
            ],
            out_specs=pl.BlockSpec((tm, 128), lambda i, k: (i, 0)),
            scratch_shapes=[pltpu.VMEM((tm, E), jnp.float32)],
        ),
        compiler_params=pltpu.CompilerParams(
            # M tiles shard across TensorCores (v7x); K is the reduction axis.
            dimension_semantics=("parallel", "arbitrary"),
            # Tiles are small (<1 MiB double-buffered); 32 MiB is safe on v5e/v6e/v7x.
            vmem_limit_bytes=32 * 1024 * 1024,
        ),
    )(x_p, w1_p, b1_row, w2_row, b2_s)

    # Lane-dense slab -> logits.view(-1)
    return out[:B, 0]


def make_params(key, in_features, emb_dim=256):
    """Deterministic synthetic parameters (not a checkpoint load)."""
    k1, k2, k3, k4 = jax.random.split(key, 4)
    # Stored as [in, out] (transposed relative to nn.Linear's [out, in]).
    w1 = jax.random.normal(k1, (in_features, emb_dim), jnp.float32) * 0.02
    b1 = jax.random.normal(k2, (1, emb_dim), jnp.float32) * 0.01
    w2 = jax.random.normal(k3, (emb_dim, 1), jnp.float32) * 0.02
    b2 = jax.random.normal(k4, (1, 1), jnp.float32) * 0.01
    return w1, b1, w2, b2


if __name__ == "__main__":
    key = jax.random.PRNGKey(0)
    k_x, k_p = jax.random.split(key)

    B, C, H, W = 2, 4, 16, 16
    x = jax.random.normal(k_x, (B, C, H, W), jnp.float32)

    w1, b1, w2, b2 = make_params(k_p, in_features=C * H * W, emb_dim=256)

    logits = screenshot_classifier_forward(x, w1, b1, w2, b2)
    jax.block_until_ready(logits)

    # Reference check of the same math (bf16 matmul operands, f32 accumulation),
    # matching the kernel's numerics.
    x_flat = x.reshape(B, -1)
    emb_ref = jnp.maximum(
        jnp.dot(
            x_flat.astype(jnp.bfloat16),
            w1.astype(jnp.bfloat16),
            preferred_element_type=jnp.float32,
        )
        + b1,
        0.0,
    )
    ref = (emb_ref * w2.reshape(1, -1)).sum(axis=-1) + b2.reshape(())
    assert logits.shape == (B,)
    assert jnp.allclose(logits, ref, atol=1e-2, rtol=1e-2), (logits, ref)

    print("KERNEL_OK")
</pallas_src>

<mosaic_0001>
module attributes {stable_mosaic.version = 11 : i64} {
  func.func @_classifier_kernel(%arg0: i32, %arg1: i32, %arg2: memref<8x512xbf16, #tpu.memory_space<vmem>>, %arg3: memref<512x256xbf16, #tpu.memory_space<vmem>>, %arg4: memref<1x256xf32, #tpu.memory_space<vmem>>, %arg5: memref<1x256xf32, #tpu.memory_space<vmem>>, %arg6: memref<1x1xf32, #tpu.memory_space<vmem>>, %arg7: memref<8x128xf32, #tpu.memory_space<vmem>>, %arg8: memref<8x256xf32, #tpu.memory_space<vmem>>) attributes {dimension_semantics = [#tpu.dimension_semantics<parallel>, #tpu.dimension_semantics<arbitrary>], iteration_bounds = array<i64: 1, 2>, scalar_prefetch = 0 : i64, scratch_operands = 1 : i64, tpu.core_type = #tpu.core_type<tc>, window_params = [{transform_indices = @transform_0, window_bounds = array<i64: 8, 512>}, {transform_indices = @transform_1, window_bounds = array<i64: 512, 256>}, {pipeline_mode = #tpu.pipeline_mode<synchronous>, transform_indices = @transform_2, window_bounds = array<i64: 1, 256>}, {pipeline_mode = #tpu.pipeline_mode<synchronous>, transform_indices = @transform_3, window_bounds = array<i64: 1, 256>}, {pipeline_mode = #tpu.pipeline_mode<synchronous>, transform_indices = @transform_4, window_bounds = array<i64: 1, 1>}, {transform_indices = @transform_5, window_bounds = array<i64: 8, 128>}]} {
    %c0_i32 = arith.constant 0 : i32
    %0 = arith.cmpi eq, %arg1, %c0_i32 : i32
    %1 = arith.extui %0 : i1 to i32
    %c0_i32_0 = arith.constant 0 : i32
    %2 = arith.cmpi ne, %1, %c0_i32_0 : i32
    scf.if %2 {
      %cst_9 = arith.constant 0.000000e+00 : f32
      %12 = vector.broadcast %cst_9 : f32 to vector<8x256xf32>
      %c0_10 = arith.constant 0 : index
      %c0_11 = arith.constant 0 : index
      %13 = vector.load %arg8[%c0_10, %c0_11] : memref<8x256xf32, #tpu.memory_space<vmem>>, vector<8x256xf32>
      tpu.vector_store %arg8[%c0_10, %c0_11], %12 {strides = array<i32>} : memref<8x256xf32, #tpu.memory_space<vmem>>, vector<8x256xf32>,
    } else {
    }
    %c0 = arith.constant 0 : index
    %c0_1 = arith.constant 0 : index
    %3 = vector.load %arg8[%c0, %c0_1] : memref<8x256xf32, #tpu.memory_space<vmem>>, vector<8x256xf32>
    %c0_2 = arith.constant 0 : index
    %c0_3 = arith.constant 0 : index
    %4 = vector.load %arg2[%c0_2, %c0_3] : memref<8x512xbf16, #tpu.memory_space<vmem>>, vector<8x512xbf16>
    %c0_4 = arith.constant 0 : index
    %c0_5 = arith.constant 0 : index
    %5 = vector.load %arg3[%c0_4, %c0_5] : memref<512x256xbf16, #tpu.memory_space<vmem>>, vector<512x256xbf16>
    %cst = arith.constant dense<0.000000e+00> : vector<8x256xf32>
    %6 = tpu.matmul %4, %5, %cst {dimension_numbers = #tpu.dot_dimension_numbers<[1], [0], [0], [1], [0, 0, 1, 1], [], []>} : vector<8x512xbf16>, vector<512x256xbf16>, vector<8x256xf32> -> vector<8x256xf32>
    %7 = arith.addf %3, %6 : vector<8x256xf32>
    %c0_6 = arith.constant 0 : index
    %c0_7 = arith.constant 0 : index
    %8 = vector.load %arg8[%c0_6, %c0_7] : memref<8x256xf32, #tpu.memory_space<vmem>>, vector<8x256xf32>
    tpu.vector_store %arg8[%c0_6, %c0_7], %7 {strides = array<i32>} : memref<8x256xf32, #tpu.memory_space<vmem>>, vector<8x256xf32>,
    %c1_i32 = arith.constant 1 : i32
    %9 = arith.cmpi eq, %arg1, %c1_i32 : i32
    %10 = arith.extui %9 : i1 to i32
    %c0_i32_8 = arith.constant 0 : i32
    %11 = arith.cmpi ne, %10, %c0_i32_8 : i32
    scf.if %11 {
      %c0_9 = arith.constant 0 : index
      %c0_10 = arith.constant 0 : index
      %12 = vector.load %arg8[%c0_9, %c0_10] : memref<8x256xf32, #tpu.memory_space<vmem>>, vector<8x256xf32>
      %c0_11 = arith.constant 0 : index
      %c0_12 = arith.constant 0 : index
      %13 = vector.load %arg4[%c0_11, %c0_12] : memref<1x256xf32, #tpu.memory_space<vmem>>, vector<1x256xf32>
      %14 = vector.broadcast %13 : vector<1x256xf32> to vector<8x256xf32>
      %15 = arith.addf %12, %14 : vector<8x256xf32>
      %cst_13 = arith.constant 0.000000e+00 : f32
      %16 = vector.broadcast %cst_13 : f32 to vector<8x256xf32>
      %17 = arith.maximumf %15, %16 : vector<8x256xf32>
      %c0_14 = arith.constant 0 : index
      %c0_15 = arith.constant 0 : index
      %18 = vector.load %arg5[%c0_14, %c0_15] : memref<1x256xf32, #tpu.memory_space<vmem>>, vector<1x256xf32>
      %19 = vector.broadcast %18 : vector<1x256xf32> to vector<8x256xf32>
      %20 = arith.mulf %17, %19 : vector<8x256xf32>
      %cst_16 = arith.constant dense<0.000000e+00> : vector<8xf32>
      %21 = vector.multi_reduction <add>, %20, %cst_16 [1] : vector<8x256xf32> to vector<8xf32>
      %22 = vector.shape_cast %21 : vector<8xf32> to vector<8x1xf32>
      %c0_17 = arith.constant 0 : index
      %c0_18 = arith.constant 0 : index
      %23 = vector.load %arg6[%c0_17, %c0_18] : memref<1x1xf32, #tpu.memory_space<vmem>>, vector<1x1xf32>
      %24 = vector.broadcast %23 : vector<1x1xf32> to vector<8x1xf32>
      %25 = arith.addf %22, %24 : vector<8x1xf32>
      %26 = vector.shape_cast %25 : vector<8x1xf32> to vector<8x1xf32>
      %27 = vector.broadcast %26 : vector<8x1xf32> to vector<8x128xf32>
      %c0_19 = arith.constant 0 : index
      %c0_20 = arith.constant 0 : index
      %28 = vector.load %arg7[%c0_19, %c0_20] : memref<8x128xf32, #tpu.memory_space<vmem>>, vector<8x128xf32>
      tpu.vector_store %arg7[%c0_19, %c0_20], %27 {strides = array<i32>} : memref<8x128xf32, #tpu.memory_space<vmem>>, vector<8x128xf32>,
    } else {
    }
    return
  }
  func.func @transform_0(%arg0: i32, %arg1: i32) -> (i32, i32) {
    %c0_i32 = arith.constant 0 : i32
    return %arg0, %arg1 : i32, i32
  }
  func.func @transform_1(%arg0: i32, %arg1: i32) -> (i32, i32) {
    %c0_i32 = arith.constant 0 : i32
    %c0_i32_0 = arith.constant 0 : i32
    return %arg1, %c0_i32 : i32, i32
  }
  func.func @transform_2(%arg0: i32, %arg1: i32) -> (i32, i32) {
    %c0_i32 = arith.constant 0 : i32
    %c0_i32_0 = arith.constant 0 : i32
    %c0_i32_1 = arith.constant 0 : i32
    return %c0_i32, %c0_i32_0 : i32, i32
  }
  func.func @transform_3(%arg0: i32, %arg1: i32) -> (i32, i32) {
    %c0_i32 = arith.constant 0 : i32
    %c0_i32_0 = arith.constant 0 : i32
    %c0_i32_1 = arith.constant 0 : i32
    return %c0_i32, %c0_i32_0 : i32, i32
  }
  func.func @transform_4(%arg0: i32, %arg1: i32) -> (i32, i32) {
    %c0_i32 = arith.constant 0 : i32
    %c0_i32_0 = arith.constant 0 : i32
    %c0_i32_1 = arith.constant 0 : i32
    return %c0_i32, %c0_i32_0 : i32, i32
  }
  func.func @transform_5(%arg0: i32, %arg1: i32) -> (i32, i32) {
    %c0_i32 = arith.constant 0 : i32
    %c0_i32_0 = arith.constant 0 : i32
    return %arg0, %c0_i32 : i32, i32
  }
}

</mosaic_0001>

<bundles_post_ra>
// kernel: tpu_custom_call.1
= control target key start
LH: loop header
LB: loop body
LE: loop exit
PB: predicated region body
PF: predicated region fallthrough
CT: control target
= control target key end

     0   :  { %s1664_s0 = inlined_call_operand.hbm [shape: bf16[8,1024], index: 0, kind: input, shape index: {}]   ;;  %s1665_s1 = inlined_call_operand.hbm [shape: bf16[1024,256], index: 1, kind: input, shape index: {}]   ;;  %s1666_s2 = inlined_call_operand.vmem [shape: f32[1,256], index: 2, kind: input, shape index: {}]   ;;  %s1667_s3 = inlined_call_operand.vmem [shape: f32[1,256], index: 3, kind: input, shape index: {}]   ;;  %s1668_s4 = inlined_call_operand.<no memory space> [shape: f32[1,1], index: 4, kind: input, shape index: {}]   ;;  %s1669_s5 = inlined_call_operand.hbm [shape: f32[8,128], index: 5, kind: output, shape index: {}]  }
   0x1   :  { %v10_v0 = vstv %s1668_s4 }
   0x2   :  { %11 = vst [vmem:[#allocation3] sm:$0x1] %v10_v0 }
   0x3   :  { %12 = vsyncpa [#allocation5], 0 }
   0x4   :  { %14 = vsyncpa [#allocation5 + $0x1], 0 }
   0x5   :  { %15 = vsyncpa [#allocation8], 0 }
   0x6   :  { %17 = vsyncpa [#allocation8 + $0x1], 0 }
   0x7   :  { %18 = vsyncpa [#allocation6], 0  ;;  %s1387_s20 = smov 0   ;;  %s1389_s21 = smov 0  }
   0x8   :  { %s1391_s22 = smov 0   ;;  %s1393_s23 = smov 0  }
   0x9   :  { %s1395_s24 = smov 0   ;;  %s1397_s25 = smov 0  }
   0xa LB: > { %s938_s4 = sadd.s32 4294967295, %s1345_s25   ;;  %s33_s26 = sadd.s32 1, %s1341_s24  ;;  %s1345_s25 = sphi %s1397_s25, %s24_s25   ;;  %s1341_s24 = sphi %s1395_s24, %s1683_s24   ;;  %s1337_s23 = sphi %s1393_s23, %s1682_s23   ;;  %s1333_s22 = sphi %s1391_s22, %s1681_s22   ;;  %s1329_s21 = sphi %s1389_s21, %s1680_s21   ;;  %s1325_s20 = sphi %s1387_s20, %s1679_s20  }
   0xb   : > { %p34_p0 = scmp.ge.s32.totalorder %s33_s26, 2  ;;  %s45_s27 = sadd.s32 1, %s1333_s22 }
   0xc   : > { %p52_p1 = scmp.ne.s32.totalorder %s1333_s22, %s1329_s21  ;;  %p53_p2 = scmp.eq.s32.totalorder %s1345_s25, 0 }
   0xd   : > { %s1685_s26 = smov (%p34_p0, %s33_s26), 0  ;;  %p58_p4 = scmp.ne.s32.totalorder %s1329_s21, %s1325_s20 }
   0xe   : > { %p1423_p3 = por %p53_p2, %p52_p1  ;;  %s41_s29 = ssub.s32 %s1341_s24, %s1685_s26 }
   0xf   : > { %p59_p5 = scmp.eq.s32.totalorder %s938_s4, 0  ;;  %p43_p6 = scmp.eq.s32.totalorder %s41_s29, 0 }
  0x10   : > { %p1044_p8 = scmp.lt.s32.totalorder %s1345_s25, 2  ;;  %s1441_s7 = sand.u32 1, %s1333_s22  }
  0x11   : > { %p1432_p7 = por %p59_p5, %p58_p4  ;;  %s1026_s8 = sshll.u32 %s1341_s24, 8 }
  0x12   : > { %s1438_s6 = scalar_select %p43_p6, %s1333_s22, %s45_s27  }
  0x13   : > { %s1672_s30 = scalar_select %p1432_p7, 1, 0 }
  0x14   : > { %s941_s9 = sshll.u32 %s1441_s7, 4  ;;  %s1448_s12 = scalar_lea.hbm %s1664_s0, %s1026_s8 }
  0x15   : > { %s210_s13 = scalar_lea.vmem [#allocation4], %s941_s9  ;;  %p1452_p9 = pnand %p1044_p8, %p1423_p3 }
  0x16   : > { %s220_s14 = sshll.u32 %s210_s13, 4  ;;  %s207_s16 = scalar_lea.sflag [#allocation5], %s1441_s7  ;;  %s1456_s14 = int_to_ptr.vmem [resolvable:$true] %s220_s14 }
  0x17   : > { %s1201_s17 = scalar_lea.hbm %s1448_s12, 256  ;;  %p1203_p13 = pneg %p1452_p9 }
  0x18   : > { %p1202_p12 = scmp.ne.s32.totalorder %s1448_s12, %s1201_s17  ;;  %s1206_s20 = scalar_lea.hbm %s1664_s0, 512 }
  0x19   : > { %p1207_p2 = scmp.lt.u32.totalorder %s1448_s12, %s1664_s0  ;;  %p1208_p3 = scmp.lt.u32.totalorder %s1206_s20, %s1201_s17 }
  0x1a   : > { %p1204_p0 = pnand %p1203_p13, %p1202_p12  ;;  %p1210_p5 = scmp.lt.u32.totalorder %s1201_s17, %s1448_s12 }
  0x1b   : > { %p1209_p4 = por %p1208_p3, %p1207_p2 }
  0x1c   : > { %p1205_p1 = pneg %p1204_p0 }
  0x1d   : > { %p1211_p6 = por %p1210_p5, %p1209_p4 }
  0x1f   : > { %p1212_p8 = pnand %p1211_p6, %p1205_p1 }
  0x21   : > { %1215 = shalt.err (!%p1212_p8)
}
  0x22   : > { %s1216_s29 = scalar_lea.vmem %s1456_s14, 256  ;;  %s1347_s8 = smov [#allocation4]  }
  0x23   : > { %p1217_p12 = scmp.ne.s32.totalorder %s1456_s14, %s1216_s29  ;;  %s1221_s9 = sshll.u32 %s1347_s8, 4  ;;  %s1222_s9 = int_to_ptr.vmem [resolvable:$false] %s1221_s9 }
  0x24   : > { %s1223_s10 = scalar_lea.vmem %s1222_s9, 512  ;;  %p1224_p11 = scmp.lt.s32.totalorder %s1456_s14, %s1222_s9 }
  0x25   : > { %p1219_p0 = pnand %p1217_p12, %p1203_p13  ;;  %p1225_p2 = scmp.lt.s32.totalorder %s1223_s10, %s1216_s29 }
  0x27   : > { %p1220_p10 = pneg %p1219_p0  ;;  %p1226_p3 = por %p1225_p2, %p1224_p11 }
  0x29   : > { %p1227_p4 = pnand %p1226_p3, %p1220_p10 }
  0x2b   : > { %1230 = shalt.err (!%p1227_p4)
}
  0x2c   : > { %1040 = dma.hbm_to_vmem [thread:$0]  (!%p1452_p9), %s1448_s12, 256, %s1456_s14, %s207_s16  }
  0x2d   : > { %p1674_p1 = scmp.lt.s32.totalorder %s1345_s25, 3  ;;  %p1675_p5 = scmp.ge.s32.totalorder %s1345_s25, 1 }
  0x2e   : > { %s944_s13 = sshll.u32 %s1441_s7, 9  ;;  %s1028_s17 = sshll.u32 %s1341_s24, 13 }
  0x2f   : > { %p1490_p6 = pnand %p1675_p5, %p1674_p1  ;;  %s1499_s20 = scalar_lea.hbm %s1665_s1, %s1028_s17 }
  0x30   : > { %s231_s27 = scalar_lea.vmem [#allocation7], %s944_s13  ;;  %s228_s12 = scalar_lea.sflag [#allocation8], %s1441_s7 }
  0x31   : > { %s239_s28 = sshll.u32 %s231_s27, 4  ;;  %s1231_s14 = scalar_lea.hbm %s1499_s20, 8192  ;;  %s1501_s28 = int_to_ptr.vmem [resolvable:$true] %s239_s28 }
  0x32   : > { %p1232_p10 = scmp.ne.s32.totalorder %s1499_s20, %s1231_s14  ;;  %s1236_s8 = scalar_lea.hbm %s1665_s1, 16384 }
  0x33   : > { %p1237_p12 = scmp.lt.u32.totalorder %s1499_s20, %s1665_s1  ;;  %p1238_p0 = scmp.lt.u32.totalorder %s1236_s8, %s1231_s14 }
  0x34   : > { %p1234_p11 = pnand %p1232_p10, %p1203_p13  ;;  %p1240_p3 = scmp.lt.u32.totalorder %s1231_s14, %s1499_s20 }
  0x35   : > { %p1239_p2 = por %p1238_p0, %p1237_p12 }
  0x36   : > { %p1235_p8 = pneg %p1234_p11 }
  0x37   : > { %p1241_p4 = por %p1240_p3, %p1239_p2 }
  0x39   : > { %p1242_p1 = pnand %p1241_p4, %p1235_p8 }
  0x3b   : > { %1245 = shalt.err (!%p1242_p1)
}
  0x3c   : > { %s1246_s13 = scalar_lea.vmem %s1501_s28, 8192  ;;  %s1348_s17 = smov [#allocation7]  }
  0x3d   : > { %p1247_p5 = scmp.ne.s32.totalorder %s1501_s28, %s1246_s13  ;;  %s1251_s18 = sshll.u32 %s1348_s17, 4  ;;  %s1252_s18 = int_to_ptr.vmem [resolvable:$false] %s1251_s18 }
  0x3e   : > { %s1253_s19 = scalar_lea.vmem %s1252_s18, 16384  ;;  %p1254_p7 = scmp.lt.s32.totalorder %s1501_s28, %s1252_s18 }
  0x3f   : > { %p1249_p10 = pnand %p1247_p5, %p1203_p13  ;;  %p1255_p12 = scmp.lt.s32.totalorder %s1253_s19, %s1246_s13 }
  0x41   : > { %p1250_p11 = pneg %p1249_p10  ;;  %p1256_p0 = por %p1255_p12, %p1254_p7 }
  0x43   : > { %p1257_p2 = pnand %p1256_p0, %p1250_p11 }
  0x45   : > { %1260 = shalt.err (!%p1257_p2)
}
  0x46   : > { %s1349_s27 = smov 128   ;;  %s1350_s14 = smov 8  }
  0x47   : > { %1043 = dma.hbm_to_vmem [thread:$0]  (!%p1452_p9), %s1499_s20, 8192, %s1501_s28, %s228_s12, %s1349_s27, %s1349_s27, %s1350_s14  }
  0x48   : > { %251 = sbr.rel (%p1490_p6) target bundleno = 689 (0x2b1), region = 40  ;;  %s253_s16 = sand.u32 (!%p1490_p6), 1, %s1329_s21  }
  0x49   : > { %s949_s29 = sshll.u32 (!%p1490_p6), %s253_s16, 4  ;;  %s254_s8 = scalar_lea.sflag (!%p1490_p6), [#allocation5], %s253_s16 }
  0x4a   : > { %s1532_s9 = scalar_lea.vmem (!%p1490_p6), [#allocation4], %s949_s29  ;;  %p1677_p7 = scmp.ne.s32.totalorder (!%p1490_p6), %s1672_s30, 0 }
  0x4f   : > { %1312 = dma.done.wait (%p1677_p7), %s254_s8, 256  }
  0x50   : > { %1314 = vsyncadd (%p1677_p7), %s254_s8, 4294967040  ;;  %s950_s10 = sshll.u32 %s253_s16, 9  ;;  %s263_s15 = scalar_lea.sflag [#allocation8], %s253_s16 }
  0x51   : > { %s1538_s7 = scalar_lea.vmem [#allocation7], %s950_s10 }
  0x52   : > { %1316 = dma.done.wait (%p1677_p7), %s263_s15, 8192  }
  0x53   : > { %1318 = vsyncadd (%p1677_p7), %s263_s15, 4294959104  ;;  %p951_p9 = scmp.ne.s32.totalorder %s1337_s23, 0 }
  0x54   : > { %v1351_v1 = vmov (!%p951_p9), 0.0  }
  0x55   : > { %298 = sbr.rel (%p951_p9) target bundleno = 92 (0x5c), region = 52  ;;  %299 = vst [vmem:[#allocation2] sm:$0xff] (!%p951_p9), %v1351_v1  ;;  %300 = vst [vmem:[#allocation2 + $0x8] sm:$0xff] (!%p951_p9), %v1351_v1 }
  0x5c PF: > { %v1100_v2 = vld [vmem:[%s1538_s7 + $0x4] ss:$8 sps:$4 sm:$0xff]   ;;  %v1104_v4 = vld [vmem:[%s1538_s7] ss:$8 sps:$4 sm:$0xff]   ;;  %v1106_v6 = vld [vmem:[%s1538_s7 + $0x14] ss:$8 sps:$4 sm:$0xff]  }
  0x5d   : > { %v1102_v3 = vld [vmem:[%s1538_s7 + $0x104] ss:$8 sps:$4 sm:$0xff]   ;;  %703 = vmatprep.subr.bf16.mxu0 %v1100_v2  ;;  %v1105_v5 = vld [vmem:[%s1538_s7 + $0x100] ss:$8 sps:$4 sm:$0xff]   ;;  %v1108_v7 = vld [vmem:[%s1538_s7 + $0x114] ss:$8 sps:$4 sm:$0xff]  }
  0x5e   : > { %744 = vmatprep.subr.bf16.mxu1 %v1102_v3  ;;  %704 = vmatpush1.bf16.msra.mxu0 %v1104_v4  ;;  %v1110_v8 = vld [vmem:[%s1538_s7 + $0x10] ss:$8 sps:$4 sm:$0xff]   ;;  %v1112_v10 = vld [vmem:[%s1538_s7 + $0x24] ss:$8 sps:$4 sm:$0xff]   ;;  %v1116_v12 = vld [vmem:[%s1538_s7 + $0x20] ss:$8 sps:$4 sm:$0xff]  }
  0x5f   : > { %745 = vmatpush1.bf16.msra.mxu1 %v1105_v5  ;;  %705 = vmatprep.subr.bf16.mxu0 %v1106_v6  ;;  %v1111_v9 = vld [vmem:[%s1538_s7 + $0x110] ss:$8 sps:$4 sm:$0xff]   ;;  %v1114_v11 = vld [vmem:[%s1538_s7 + $0x124] ss:$8 sps:$4 sm:$0xff]   ;;  %v1117_v13 = vld [vmem:[%s1538_s7 + $0x120] ss:$8 sps:$4 sm:$0xff]  }
  0x60   : > { %746 = vmatprep.subr.bf16.mxu1 %v1108_v7  ;;  %v1118_v14 = vld [vmem:[%s1538_s7 + $0x34] ss:$8 sps:$4 sm:$0xff]   ;;  %v1122_v16 = vld [vmem:[%s1538_s7 + $0x30] ss:$8 sps:$4 sm:$0xff]   ;;  %v1124_v18 = vld [vmem:[%s1538_s7 + $0x44] ss:$8 sps:$4 sm:$0xff]  }
  0x61   : > { %v1120_v15 = vld [vmem:[%s1538_s7 + $0x134] ss:$8 sps:$4 sm:$0xff]   ;;  %v1123_v17 = vld [vmem:[%s1538_s7 + $0x130] ss:$8 sps:$4 sm:$0xff]   ;;  %v1126_v19 = vld [vmem:[%s1538_s7 + $0x144] ss:$8 sps:$4 sm:$0xff]  }
  0x62   : > { %706 = vmatpush1.bf16.msra.mxu0 %v1110_v8  ;;  %v1128_v20 = vld [vmem:[%s1538_s7 + $0x40] ss:$8 sps:$4 sm:$0xff]   ;;  %v1130_v22 = vld [vmem:[%s1538_s7 + $0x54] ss:$8 sps:$4 sm:$0xff]   ;;  %v1134_v24 = vld [vmem:[%s1538_s7 + $0x50] ss:$8 sps:$4 sm:$0xff]  }
  0x63   : > { %747 = vmatpush1.bf16.msra.mxu1 %v1111_v9  ;;  %707 = vmatprep.subr.bf16.mxu0 %v1112_v10  ;;  %v1129_v21 = vld [vmem:[%s1538_s7 + $0x140] ss:$8 sps:$4 sm:$0xff]   ;;  %v1132_v23 = vld [vmem:[%s1538_s7 + $0x154] ss:$8 sps:$4 sm:$0xff]   ;;  %v1135_v25 = vld [vmem:[%s1538_s7 + $0x150] ss:$8 sps:$4 sm:$0xff]  }
  0x64   : > { %748 = vmatprep.subr.bf16.mxu1 %v1114_v11  ;;  %v1136_v26 = vld [vmem:[%s1538_s7 + $0x64] ss:$8 sps:$4 sm:$0xff]   ;;  %v1140_v28 = vld [vmem:[%s1538_s7 + $0x60] ss:$8 sps:$4 sm:$0xff]   ;;  %v1142_v30 = vld [vmem:[%s1538_s7 + $0x74] ss:$8 sps:$4 sm:$0xff]  }
  0x65   : > { %v1138_v27 = vld [vmem:[%s1538_s7 + $0x164] ss:$8 sps:$4 sm:$0xff]   ;;  %v1141_v29 = vld [vmem:[%s1538_s7 + $0x160] ss:$8 sps:$4 sm:$0xff]   ;;  %v1144_v31 = vld [vmem:[%s1538_s7 + $0x174] ss:$8 sps:$4 sm:$0xff]  }
  0x66   : > { %708 = vmatpush1.bf16.msra.mxu0 %v1116_v12  ;;  %v1146_v32 = vld [vmem:[%s1538_s7 + $0x70] ss:$8 sps:$4 sm:$0xff]   ;;  %v1148_v34 = vld [vmem:[%s1538_s7 + $0x84] ss:$8 sps:$4 sm:$0xff]   ;;  %v1152_v36 = vld [vmem:[%s1538_s7 + $0x80] ss:$8 sps:$4 sm:$0xff]  }
  0x67   : > { %749 = vmatpush1.bf16.msra.mxu1 %v1117_v13  ;;  %709 = vmatprep.subr.bf16.mxu0 %v1118_v14  ;;  %v1147_v33 = vld [vmem:[%s1538_s7 + $0x170] ss:$8 sps:$4 sm:$0xff]   ;;  %v1150_v35 = vld [vmem:[%s1538_s7 + $0x184] ss:$8 sps:$4 sm:$0xff]   ;;  %v1153_v37 = vld [vmem:[%s1538_s7 + $0x180] ss:$8 sps:$4 sm:$0xff]  }
  0x68   : > { %750 = vmatprep.subr.bf16.mxu1 %v1120_v15  ;;  %v1154_v38 = vld [vmem:[%s1538_s7 + $0x94] ss:$8 sps:$4 sm:$0xff]   ;;  %v1158_v40 = vld [vmem:[%s1538_s7 + $0x90] ss:$8 sps:$4 sm:$0xff]   ;;  %v1160_v42 = vld [vmem:[%s1538_s7 + $0xa4] ss:$8 sps:$4 sm:$0xff]  }
  0x69   : > { %v1156_v39 = vld [vmem:[%s1538_s7 + $0x194] ss:$8 sps:$4 sm:$0xff]   ;;  %v1159_v41 = vld [vmem:[%s1538_s7 + $0x190] ss:$8 sps:$4 sm:$0xff]   ;;  %v1162_v43 = vld [vmem:[%s1538_s7 + $0x1a4] ss:$8 sps:$4 sm:$0xff]  }
  0x6a   : > { %710 = vmatpush1.bf16.msra.mxu0 %v1122_v16  ;;  %v1164_v44 = vld [vmem:[%s1538_s7 + $0xa0] ss:$8 sps:$4 sm:$0xff]   ;;  %v1166_v46 = vld [vmem:[%s1538_s7 + $0xb4] ss:$8 sps:$4 sm:$0xff]   ;;  %v1170_v51 = vld [vmem:[%s1538_s7 + $0xb0] ss:$8 sps:$4 sm:$0xff]  }
  0x6b   : > { %751 = vmatpush1.bf16.msra.mxu1 %v1123_v17  ;;  %711 = vmatprep.subr.bf16.mxu0 %v1124_v18  ;;  %v1165_v45 = vld [vmem:[%s1538_s7 + $0x1a0] ss:$8 sps:$4 sm:$0xff]   ;;  %v1168_v47 = vld [vmem:[%s1538_s7 + $0x1b4] ss:$8 sps:$4 sm:$0xff]   ;;  %v1171_v52 = vld [vmem:[%s1538_s7 + $0x1b0] ss:$8 sps:$4 sm:$0xff]  }
  0x6c   : > { %752 = vmatprep.subr.bf16.mxu1 %v1126_v19  ;;  %v303_v48 = vld [vmem:[%s1532_s9] sm:$0xff]  ;;  %v304_v50 = vld [vmem:[%s1532_s9 + $0x8] sm:$0xff]  ;;  %p1020_p13 = scmp.ne.s32.totalorder %s1337_s23, 1 }
  0x6d   : > { %v953_v49 = vcombine.high %v303_v48, %v303_v48  ;;  %v955_v53 = vcombine.high %v304_v50, %v304_v50  ;;  %v1172_v54 = vld [vmem:[%s1538_s7 + $0xc4] ss:$8 sps:$4 sm:$0xff]   ;;  %v1176_v56 = vld [vmem:[%s1538_s7 + $0xc0] ss:$8 sps:$4 sm:$0xff]   ;;  %v1178_v58 = vld [vmem:[%s1538_s7 + $0xd4] ss:$8 sps:$4 sm:$0xff]   ;;  %v952_v6 = vcombine.low %v303_v48, %v303_v48  ;;  %v954_v7 = vcombine.low %v304_v50, %v304_v50 }
  0x6e   : > { %712 = vmatpush1.bf16.msra.mxu0 %v1128_v20  ;;  %v1174_v55 = vld [vmem:[%s1538_s7 + $0x1c4] ss:$8 sps:$4 sm:$0xff]   ;;  %v1177_v57 = vld [vmem:[%s1538_s7 + $0x1c0] ss:$8 sps:$4 sm:$0xff]   ;;  %v1180_v59 = vld [vmem:[%s1538_s7 + $0x1d4] ss:$8 sps:$4 sm:$0xff]  }
  0x6f   : > { %753 = vmatpush1.bf16.msra.mxu1 %v1129_v21  ;;  %713 = vmatprep.subr.bf16.mxu0 %v1130_v22  ;;  %v1182_v60 = vld [vmem:[%s1538_s7 + $0xd0] ss:$8 sps:$4 sm:$0xff]   ;;  %v1184_v62 = vld [vmem:[%s1538_s7 + $0xe4] ss:$8 sps:$4 sm:$0xff]   ;;  %v1188_v0 = vld [vmem:[%s1538_s7 + $0xe0] ss:$8 sps:$4 sm:$0xff]   ;;  %v797_v22 = vlaneseq (!%p1020_p13) }
  0x70   : > { %754 = vmatprep.subr.bf16.mxu1 %v1132_v23  ;;  %735 = vmatprep.mubr.bf16.mxu0 %v953_v49  ;;  %v1183_v61 = vld [vmem:[%s1538_s7 + $0x1d0] ss:$8 sps:$4 sm:$0xff]   ;;  %v1186_v63 = vld [vmem:[%s1538_s7 + $0x1e4] ss:$8 sps:$4 sm:$0xff]   ;;  %v1189_v1 = vld [vmem:[%s1538_s7 + $0x1e0] ss:$8 sps:$4 sm:$0xff]  }
  0x71   : > { %776 = vmatprep.mubr.bf16.mxu1 %v955_v53  ;;  %v1190_v2 = vld [vmem:[%s1538_s7 + $0xf4] ss:$8 sps:$4 sm:$0xff]   ;;  %v1194_v4 = vld [vmem:[%s1538_s7 + $0xf0] ss:$8 sps:$4 sm:$0xff]   ;;  %v798_v23 = vshrl.u32 (!%p1020_p13), %v797_v22, 7 }
  0x72   : > { %714 = vmatpush1.bf16.msra.mxu0 %v1134_v24  ;;  %v1192_v3 = vld [vmem:[%s1538_s7 + $0x1f4] ss:$8 sps:$4 sm:$0xff]   ;;  %v1195_v5 = vld [vmem:[%s1538_s7 + $0x1f0] ss:$8 sps:$4 sm:$0xff]  }
  0x73   : > { %755 = vmatpush1.bf16.msra.mxu1 %v1135_v25  ;;  %715 = vmatprep.subr.bf16.mxu0 %v1136_v26  ;;  %v301_v9 = vld [vmem:[#allocation2] sm:$0xff]  ;;  %v302_v13 = vld [vmem:[#allocation2 + $0x8] sm:$0xff]  ;;  %v799_v25 = vsub.s32 (!%p1020_p13), 0, %v798_v23  ;;  %v803_v26 = vsub.s32 (!%p1020_p13), 1, %v798_v23 }
  0x74   : > { %756 = vmatprep.subr.bf16.mxu1 %v1138_v27  ;;  %v795_v24 = vld [vmem:[%s1666_s2] sm:$0x3] (!%p1020_p13) }
  0x76   : > { %716 = vmatpush1.bf16.msra.mxu0 %v1140_v28 }
  0x77   : > { %757 = vmatpush1.bf16.msra.mxu1 %v1141_v29  ;;  %717 = vmatprep.subr.bf16.mxu0 %v1142_v30  ;;  %v811_v29 = vld [vmem:[%s1667_s3] sm:$0x3] (!%p1020_p13)  ;;  %v800_v30 = vrot.slane (!%p1020_p13), %v795_v24, %v799_v25 }
  0x78   : > { %758 = vmatprep.subr.bf16.mxu1 %v1144_v31  ;;  %v804_v31 = vrot.slane (!%p1020_p13), %v795_v24, %v803_v26 }
  0x7a   : > { %718 = vmatpush1.bf16.msra.mxu0 %v1146_v32 }
  0x7b   : > { %759 = vmatpush1.bf16.msra.mxu1 %v1147_v33  ;;  %719 = vmatprep.subr.bf16.mxu0 %v1148_v34  ;;  %v816_v34 = vrot.slane (!%p1020_p13), %v811_v29, %v799_v25 }
  0x7c   : > { %760 = vmatprep.subr.bf16.mxu1 %v1150_v35  ;;  %v820_v35 = vrot.slane (!%p1020_p13), %v811_v29, %v803_v26 }
  0x7e   : > { %720 = vmatpush1.bf16.msra.mxu0 %v1152_v36 }
  0x7f   : > { %761 = vmatpush1.bf16.msra.mxu1 %v1153_v37  ;;  %721 = vmatprep.subr.bf16.mxu0 %v1154_v38 }
  0x80   : > { %762 = vmatprep.subr.bf16.mxu1 %v1156_v39 }
  0x82   : > { %722 = vmatpush1.bf16.msra.mxu0 %v1158_v40 }
  0x83   : > { %763 = vmatpush1.bf16.msra.mxu1 %v1159_v41  ;;  %723 = vmatprep.subr.bf16.mxu0 %v1160_v42  ;;  %v1352_v41 = vmov (!%p1020_p13), 0   ;;  %v1021_v42 = vld [vmem:[#allocation3] ss:$0 sm:$0xff] (!%p1020_p13) }
  0x84   : > { %764 = vmatprep.subr.bf16.mxu1 %v1162_v43  ;;  %1200 = vset.pattern.permute.xlu0 (!%p1020_p13), %v1352_v41 }
  0x86   : > { %724 = vmatpush1.bf16.msra.mxu0 %v1164_v44 }
  0x87   : > { %765 = vmatpush1.bf16.msra.mxu1 %v1165_v45  ;;  %725 = vmatprep.subr.bf16.mxu0 %v1166_v46 }
  0x88   : > { %766 = vmatprep.subr.bf16.mxu1 %v1168_v47 }
  0x8a   : > { %726 = vmatpush1.bf16.msra.mxu0 %v1170_v51 }
  0x8b   : > { %767 = vmatpush1.bf16.msra.mxu1 %v1171_v52  ;;  %727 = vmatprep.subr.bf16.mxu0 %v1172_v54 }
  0x8c   : > { %768 = vmatprep.subr.bf16.mxu1 %v1174_v55 }
  0x8e   : > { %728 = vmatpush1.bf16.msra.mxu0 %v1176_v56 }
  0x8f   : > { %769 = vmatpush1.bf16.msra.mxu1 %v1177_v57  ;;  %729 = vmatprep.subr.bf16.mxu0 %v1178_v58 }
  0x90   : > { %770 = vmatprep.subr.bf16.mxu1 %v1180_v59 }
  0x92   : > { %730 = vmatpush1.bf16.msra.mxu0 %v1182_v60 }
  0x93   : > { %771 = vmatpush1.bf16.msra.mxu1 %v1183_v61  ;;  %731 = vmatprep.subr.bf16.mxu0 %v1184_v62 }
  0x94   : > { %772 = vmatprep.subr.bf16.mxu1 %v1186_v63 }
  0x96   : > { %732 = vmatpush1.bf16.msra.mxu0 %v1188_v0 }
  0x97   : > { %773 = vmatpush1.bf16.msra.mxu1 %v1189_v1  ;;  %733 = vmatprep.subr.bf16.mxu0 %v1190_v2 }
  0x98   : > { %774 = vmatprep.subr.bf16.mxu1 %v1192_v3 }
  0x9a   : > { %734 = vmatpush1.bf16.msra.mxu0 %v1194_v4 }
  0x9b   : > { %775 = vmatpush1.bf16.msra.mxu1 %v1195_v5 }
  0x9d   : > { %736 = vmatmul.mubr.bf16.vlgmr.msra.gmra.mrb[0].mxu0 %v952_v6 }
  0x9e   : > { %777 = vmatmul.mubr.bf16.vlgmr.msra.gmra.mrb[0].mxu1 %v954_v7 }
 0x170   : > { %v737_v8 = vpop.f32.mrb[0].mxu0 }
 0x171   : > { %v778_v10 = vpop.f32.mrb[0].mxu1  ;;  %v739_v12 = vpop.f32.mrb[1].mxu0  ;;  %792 = sbr.rel (%p1020_p13) target bundleno = 664 (0x298), region = 56 }
 0x172   : > { %v779_v11 = vadd.f32 %v778_v10, %v737_v8  ;;  %v780_v14 = vpop.f32.mrb[1].mxu1  ;;  %v741_v16 = vpop.f32.mrb[2].mxu0 }
 0x173   : > { %v781_v15 = vadd.f32 %v780_v14, %v739_v12  ;;  %v782_v17 = vpop.f32.mrb[2].mxu1  ;;  %v742_v19 = vpop.f32.mrb[3].mxu0 }
 0x174   : > { %v785_v18 = vadd.f32 %v779_v11, %v301_v9  ;;  %v783_v20 = vpop.f32.mrb[3].mxu1 }
 0x175   : > { %v786_v21 = vadd.f32 %v781_v15, %v302_v13 }
 0x176   : > { %787 = vst [vmem:[#allocation2] sm:$0xff] %v785_v18 }
 0x177   : > { %788 = vst [vmem:[#allocation2 + $0x8] sm:$0xff] %v786_v21 }
 0x17d   : > { %v793_v27 = vld [vmem:[#allocation2] sm:$0xff] }
 0x17e   : > { %v794_v28 = vld [vmem:[#allocation2 + $0x8] sm:$0xff]  ;;  %v807_v32 = vadd.f32 %v800_v30, %v793_v27 }
 0x17f   : > { %v808_v33 = vadd.f32 %v804_v31, %v794_v28 }
 0x180   : > { %v809_v36 = vmax.f32 %v807_v32, 0.0 }
 0x181   : > { %v810_v37 = vmax.f32 %v808_v33, 0.0 }
 0x182   : > { %v823_v38 = vmul.f32 %v816_v34, %v809_v36 }
 0x183   : > { %v824_v39 = vmul.f32 %v820_v35, %v810_v37 }
 0x185   : > { %v825_v40 = vadd.f32 %v824_v39, %v823_v38 }
 0x187   : > { %826 = vadd.xlane.f32.xlu0 %v825_v40 }
 0x214   : > { %v827_v43 = vpop.xlane.xlu0 %826 }
 0x215   : > { %v835_v44 = vadd.f32 %v1021_v42, %v827_v43 }
 0x217   : > { %838 = vperm.xlu0 %1200, %v835_v44  }
 0x296   : > { %v839_v45 = vpop.permute.xlu0 %838 }
 0x297   : > { %841 = vst [vmem:[#allocation9] sm:$0xff] %v839_v45 }
 0x298 PF: > { %p1620_p6 = scmp.eq.s32.totalorder %s938_s4, 1  ;;  %s1353_s12 = smov [#allocation9]  }
 0x299   : > { %s851_s13 = sshll.u32 %s1353_s12, 4  ;;  %s852_s13 = int_to_ptr.vmem [resolvable:$true] %s851_s13 }
 0x29a   : > { %s1261_s17 = scalar_lea.vmem %s852_s13, 128  ;;  %p1268_p1 = scmp.lt.s32.totalorder %s852_s13, %s852_s13 }
 0x29b   : > { %p1262_p8 = scmp.ne.s32.totalorder %s852_s13, %s1261_s17  ;;  %p1269_p5 = scmp.lt.s32.totalorder %s1261_s17, %s1261_s17 }
 0x29d   : > { %p1263_p3 = pnand %p1262_p8, %p1620_p6  ;;  %p1270_p10 = por %p1269_p5, %p1268_p1 }
 0x29f   : > { %p1264_p4 = pneg %p1263_p3 }
 0x2a1   : > { %p1271_p11 = pnand %p1270_p10, %p1264_p4 }
 0x2a3   : > { %1274 = shalt.err (!%p1271_p11)
}
 0x2a4   : > { %s1275_s4 = scalar_lea.hbm %s1669_s5, 128 }
 0x2a5   : > { %p1276_p12 = scmp.ne.s32.totalorder %s1669_s5, %s1275_s4  ;;  %p1281_p7 = scmp.lt.u32.totalorder %s1275_s4, %s1669_s5 }
 0x2a7   : > { %p1277_p0 = pnand %p1276_p12, %p1620_p6 }
 0x2a9   : > { %p1278_p2 = pneg %p1277_p0 }
 0x2ab   : > { %p1283_p9 = pnand %p1281_p7, %p1278_p2 }
 0x2ad   : > { %1286 = shalt.err (!%p1283_p9)
}
 0x2ae   : > { %1034 = dma.vmem_to_hbm [thread:$0]  (%p1620_p6), %s852_s13, 128, %s1669_s5, [#allocation6]  }
 0x2af   : > { %1320 = dma.done.wait (%p1620_p6), [#allocation6], 128  }
 0x2b0   : > { %1322 = vsyncadd (%p1620_p6), [#allocation6], 4294967168 }
 0x2b1 PF: > { %s24_s25 = sadd.s32 1, %s1345_s25   ;;  %s1679_s20 = smov %s1329_s21 }
 0x2b2   : > { %p21_p13 = scmp.ge.s32.totalorder %s24_s25, 4   ;;  %s1680_s21 = smov %s1333_s22 }
 0x2b3   : > { %s1681_s22 = smov %s1438_s6  ;;  %s1682_s23 = smov %s1341_s24 }
 0x2b4   : > { %s1683_s24 = smov %s1685_s26  ;;  %23 = sbr.rel (!%p21_p13) target bundleno = 10 (0xa), region = 99 }
 0x2bb   :  { %864 = vsyncpa [#allocation5], 1 }
 0x2bc   :  { %866 = vsyncpa [#allocation5 + $0x1], 1 }
 0x2bd   :  { %867 = vsyncpa [#allocation8], 1 }
 0x2be   :  { %869 = vsyncpa [#allocation8 + $0x1], 1 }
 0x2bf   :  { %870 = vsyncpa [#allocation6], 1 }
 0x2c0   :  { %872 = vsyncpa [#allocation6 + $0x1], 1 }

</bundles_post_ra>
